<compile_context>
chip_gen: v7x
topology: tpu7x:2x2x1
jax: 0.10.0
libtpu: 0.0.40
codegen_flags: <defaults>
</compile_context>

<pallas_src>
import jax
import jax.numpy as jnp
from jax.experimental import pallas as pl
from jax.experimental.pallas import tpu as pltpu


VOCAB_SIZE = 50
EMBED_DIM = 16
HIDDEN_SIZE = 32
SEQ_LEN = 8


def _encoder_seq_kernel(tok_ref,    # SMEM scalar prefetch: (S,) int32 token ids
                        emb_ref,    # (V, E)   embedding table, VMEM resident
                        h0_ref,     # (1, H)   initial hidden state
                        wih_ref,    # (E, 3H)  W_ih^T  (gate order [r, z, n])
                        whh_ref,    # (H, 3H)  W_hh^T
                        bih_ref,    # (1, 3H)  b_ih
                        bhh_ref,    # (1, 3H)  b_hh
                        out_ref,    # (S, H)   per-step GRU outputs
                        hN_ref):    # (1, H)   final hidden state
    S = out_ref.shape[0]
    H = hN_ref.shape[-1]

    # 1) Gather the S embedding rows from the resident table (token ids live in SMEM).
    x_rows = [emb_ref[pl.ds(tok_ref[s], 1), :] for s in range(S)]   # each (1, E)
    x = jnp.concatenate(x_rows, axis=0)                             # (S, E)

    # 2) Hoisted input projection: one MXU pass covers every step's gi.
    gi_all = (jnp.dot(x, wih_ref[...], preferred_element_type=jnp.float32)
              + bih_ref[...])                                        # (S, 3H)

    # 3) Sequential GRU recurrence, fully unrolled (static trip count S).
    w_hh = whh_ref[...]
    b_hh = bhh_ref[...]
    h = h0_ref[...]                                                  # (1, H)
    for s in range(S):
        gi = gi_all[s:s + 1, :]                                      # (1, 3H) static slice
        gh = jnp.dot(h, w_hh, preferred_element_type=jnp.float32) + b_hh   # (1, 3H)
        # PyTorch GRU gate order [reset, update, new]; gh_n kept separate for r * gh_n.
        r = jax.nn.sigmoid(gi[:, :H] + gh[:, :H])
        z = jax.nn.sigmoid(gi[:, H:2 * H] + gh[:, H:2 * H])
        n = jnp.tanh(gi[:, 2 * H:] + r * gh[:, 2 * H:])
        h = (1.0 - z) * n + z * h                                    # (1, H)
        out_ref[pl.ds(s, 1), :] = h.astype(out_ref.dtype)

    hN_ref[...] = h.astype(hN_ref.dtype)                             # written once


@jax.jit
def encoder_forward_seq(tokens, hidden, params):
    """Run the Encoder GRU over a whole token sequence in one pallas_call.

    tokens: (S,) int32; hidden: (1, 1, H) float32.
    Returns (outputs (S, 1, H), h_final (1, 1, H)).
    """
    embed_w, wih_t, whh_t, b_ih, b_hh = params
    V, E = embed_w.shape
    H = whh_t.shape[0]
    S = tokens.shape[0]

    toks = jnp.asarray(tokens, jnp.int32).reshape((S,))
    h0 = hidden.reshape((1, H)).astype(jnp.float32)

    outs, h_n = pl.pallas_call(
        _encoder_seq_kernel,
        out_shape=(
            jax.ShapeDtypeStruct((S, H), jnp.float32),   # per-step GRU outputs
            jax.ShapeDtypeStruct((1, H), jnp.float32),   # final hidden state
        ),
        grid_spec=pltpu.PrefetchScalarGridSpec(
            num_scalar_prefetch=1,
            grid=(1,),                                   # single step: recurrence is in-kernel
            in_specs=[
                pl.BlockSpec((V, E), lambda i, tok: (0, 0)),           # resident table
                pl.BlockSpec((1, H), lambda i, tok: (0, 0)),           # h0
                pl.BlockSpec((E, 3 * H), lambda i, tok: (0, 0)),       # W_ih^T
                pl.BlockSpec((H, 3 * H), lambda i, tok: (0, 0)),       # W_hh^T
                pl.BlockSpec((1, 3 * H), lambda i, tok: (0, 0)),       # b_ih
                pl.BlockSpec((1, 3 * H), lambda i, tok: (0, 0)),       # b_hh
            ],
            out_specs=(
                pl.BlockSpec((S, H), lambda i, tok: (0, 0)),
                pl.BlockSpec((1, H), lambda i, tok: (0, 0)),
            ),
        ),
        compiler_params=pltpu.CompilerParams(
            dimension_semantics=("arbitrary",)),
    )(toks, embed_w.astype(jnp.float32), h0,
      wih_t.astype(jnp.float32), whh_t.astype(jnp.float32),
      b_ih.astype(jnp.float32), b_hh.astype(jnp.float32))

    return outs.reshape((S, 1, H)), h_n.reshape((1, 1, H))


def encoder_forward(token, hidden, params):
    """Exact Encoder.forward semantics: one token step. Returns (output, h_t), both (1,1,H)."""
    tok = jnp.asarray(token, jnp.int32).reshape((1,))
    outs, h_n = encoder_forward_seq(tok, hidden, params)
    return outs.reshape((1, 1, -1)), h_n


def init_params(key, vocab_size=VOCAB_SIZE, embed_dim=EMBED_DIM, hidden_size=HIDDEN_SIZE):
    k_e, k_wi, k_wh, k_bi, k_bh = jax.random.split(key, 5)
    scale = 1.0 / jnp.sqrt(hidden_size)
    embed_w = jax.random.normal(k_e, (vocab_size, embed_dim), jnp.float32)
    # Stored transposed relative to PyTorch's (3H, in) layout; gate order [r, z, n].
    wih_t = jax.random.uniform(k_wi, (embed_dim, 3 * hidden_size), jnp.float32, -scale, scale)
    whh_t = jax.random.uniform(k_wh, (hidden_size, 3 * hidden_size), jnp.float32, -scale, scale)
    b_ih = jax.random.uniform(k_bi, (1, 3 * hidden_size), jnp.float32, -scale, scale)
    b_hh = jax.random.uniform(k_bh, (1, 3 * hidden_size), jnp.float32, -scale, scale)
    return embed_w, wih_t, whh_t, b_ih, b_hh


def encoder_forward_ref(token, hidden, params):
    """Pure-JAX reference of the PyTorch Encoder.forward (single step)."""
    embed_w, wih_t, whh_t, b_ih, b_hh = params
    H = hidden.shape[-1]
    x = embed_w[token].reshape((1, -1))
    h = hidden.reshape((1, H))
    gi = x @ wih_t + b_ih
    gh = h @ whh_t + b_hh
    r = jax.nn.sigmoid(gi[:, :H] + gh[:, :H])
    z = jax.nn.sigmoid(gi[:, H:2 * H] + gh[:, H:2 * H])
    n = jnp.tanh(gi[:, 2 * H:] + r * gh[:, 2 * H:])
    h_new = (1.0 - z) * n + z * h
    return h_new.reshape((1, 1, H)), h_new.reshape((1, 1, H))


def encoder_forward_seq_ref(tokens, hidden, params):
    outs = []
    h = hidden
    for i in range(tokens.shape[0]):
        o, h = encoder_forward_ref(tokens[i], h, params)
        outs.append(o.reshape((1, -1)))
    return jnp.stack(outs, axis=0), h                       # (S, 1, H), (1, 1, H)


if __name__ == "__main__":
    key = jax.random.PRNGKey(0)
    k_params, k_tok, k_hid = jax.random.split(key, 3)

    params = init_params(k_params)

    tokens = jax.random.randint(k_tok, (SEQ_LEN,), 0, VOCAB_SIZE, jnp.int32)
    hidden = jax.random.normal(k_hid, (1, 1, HIDDEN_SIZE), jnp.float32)  # init_hidden() would be zeros

    # Whole-sequence path: one pallas_call (one grid step) for all SEQ_LEN encoder steps.
    outs, h_n = encoder_forward_seq(tokens, hidden, params)
    outs = jax.block_until_ready(outs)
    h_n = jax.block_until_ready(h_n)

    outs_ref, h_n_ref = encoder_forward_seq_ref(tokens, hidden, params)
    if not (jnp.allclose(outs, outs_ref, atol=1e-5, rtol=1e-5)
            and jnp.allclose(h_n, h_n_ref, atol=1e-5, rtol=1e-5)):
        raise AssertionError("Pallas GRU sequence does not match reference")

    # Single-step path (exact Encoder.forward interface).
    out1, h1 = encoder_forward(tokens[0], hidden, params)
    out1 = jax.block_until_ready(out1)
    out1_ref, _ = encoder_forward_ref(tokens[0], hidden, params)
    if not jnp.allclose(out1, out1_ref, atol=1e-5, rtol=1e-5):
        raise AssertionError("Pallas GRU single step does not match reference")

    print("KERNEL_OK")
</pallas_src>

<mosaic_0001>
module attributes {stable_mosaic.version = 11 : i64} {
  func.func @_encoder_seq_kernel(%arg0: i32, %arg1: memref<8xi32, #tpu.memory_space<smem>>, %arg2: memref<50x16xf32, #tpu.memory_space<vmem>>, %arg3: memref<1x32xf32, #tpu.memory_space<vmem>>, %arg4: memref<16x96xf32, #tpu.memory_space<vmem>>, %arg5: memref<32x96xf32, #tpu.memory_space<vmem>>, %arg6: memref<1x96xf32, #tpu.memory_space<vmem>>, %arg7: memref<1x96xf32, #tpu.memory_space<vmem>>, %arg8: memref<8x32xf32, #tpu.memory_space<vmem>>, %arg9: memref<1x32xf32, #tpu.memory_space<vmem>>) attributes {dimension_semantics = [#tpu.dimension_semantics<arbitrary>], iteration_bounds = array<i64: 1>, scalar_prefetch = 1 : i64, scratch_operands = 0 : i64, tpu.core_type = #tpu.core_type<tc>, window_params = [{pipeline_mode = #tpu.pipeline_mode<synchronous>, transform_indices = @transform_0, window_bounds = array<i64: 50, 16>}, {pipeline_mode = #tpu.pipeline_mode<synchronous>, transform_indices = @transform_1, window_bounds = array<i64: 1, 32>}, {pipeline_mode = #tpu.pipeline_mode<synchronous>, transform_indices = @transform_2, window_bounds = array<i64: 16, 96>}, {pipeline_mode = #tpu.pipeline_mode<synchronous>, transform_indices = @transform_3, window_bounds = array<i64: 32, 96>}, {pipeline_mode = #tpu.pipeline_mode<synchronous>, transform_indices = @transform_4, window_bounds = array<i64: 1, 96>}, {pipeline_mode = #tpu.pipeline_mode<synchronous>, transform_indices = @transform_5, window_bounds = array<i64: 1, 96>}, {pipeline_mode = #tpu.pipeline_mode<synchronous>, transform_indices = @transform_6, window_bounds = array<i64: 8, 32>}, {pipeline_mode = #tpu.pipeline_mode<synchronous>, transform_indices = @transform_7, window_bounds = array<i64: 1, 32>}]} {
    %c0 = arith.constant 0 : index
    %0 = memref.load %arg1[%c0] : memref<8xi32, #tpu.memory_space<smem>>
    %1 = arith.index_cast %0 : i32 to index
    %c0_0 = arith.constant 0 : index
    %2 = vector.load %arg2[%1, %c0_0] : memref<50x16xf32, #tpu.memory_space<vmem>>, vector<1x16xf32>
    %c1 = arith.constant 1 : index
    %3 = memref.load %arg1[%c1] : memref<8xi32, #tpu.memory_space<smem>>
    %4 = arith.index_cast %3 : i32 to index
    %c0_1 = arith.constant 0 : index
    %5 = vector.load %arg2[%4, %c0_1] : memref<50x16xf32, #tpu.memory_space<vmem>>, vector<1x16xf32>
    %c2 = arith.constant 2 : index
    %6 = memref.load %arg1[%c2] : memref<8xi32, #tpu.memory_space<smem>>
    %7 = arith.index_cast %6 : i32 to index
    %c0_2 = arith.constant 0 : index
    %8 = vector.load %arg2[%7, %c0_2] : memref<50x16xf32, #tpu.memory_space<vmem>>, vector<1x16xf32>
    %c3 = arith.constant 3 : index
    %9 = memref.load %arg1[%c3] : memref<8xi32, #tpu.memory_space<smem>>
    %10 = arith.index_cast %9 : i32 to index
    %c0_3 = arith.constant 0 : index
    %11 = vector.load %arg2[%10, %c0_3] : memref<50x16xf32, #tpu.memory_space<vmem>>, vector<1x16xf32>
    %c4 = arith.constant 4 : index
    %12 = memref.load %arg1[%c4] : memref<8xi32, #tpu.memory_space<smem>>
    %13 = arith.index_cast %12 : i32 to index
    %c0_4 = arith.constant 0 : index
    %14 = vector.load %arg2[%13, %c0_4] : memref<50x16xf32, #tpu.memory_space<vmem>>, vector<1x16xf32>
    %c5 = arith.constant 5 : index
    %15 = memref.load %arg1[%c5] : memref<8xi32, #tpu.memory_space<smem>>
    %16 = arith.index_cast %15 : i32 to index
    %c0_5 = arith.constant 0 : index
    %17 = vector.load %arg2[%16, %c0_5] : memref<50x16xf32, #tpu.memory_space<vmem>>, vector<1x16xf32>
    %c6 = arith.constant 6 : index
    %18 = memref.load %arg1[%c6] : memref<8xi32, #tpu.memory_space<smem>>
    %19 = arith.index_cast %18 : i32 to index
    %c0_6 = arith.constant 0 : index
    %20 = vector.load %arg2[%19, %c0_6] : memref<50x16xf32, #tpu.memory_space<vmem>>, vector<1x16xf32>
    %c7 = arith.constant 7 : index
    %21 = memref.load %arg1[%c7] : memref<8xi32, #tpu.memory_space<smem>>
    %22 = arith.index_cast %21 : i32 to index
    %c0_7 = arith.constant 0 : index
    %23 = vector.load %arg2[%22, %c0_7] : memref<50x16xf32, #tpu.memory_space<vmem>>, vector<1x16xf32>
    %24 = tpu.concatenate %2, %5, %8, %11, %14, %17, %20, %23 in 0 : vector<1x16xf32>, vector<1x16xf32>, vector<1x16xf32>, vector<1x16xf32>, vector<1x16xf32>, vector<1x16xf32>, vector<1x16xf32>, vector<1x16xf32> -> vector<8x16xf32>
    %c0_8 = arith.constant 0 : index
    %c0_9 = arith.constant 0 : index
    %25 = vector.load %arg4[%c0_8, %c0_9] : memref<16x96xf32, #tpu.memory_space<vmem>>, vector<16x96xf32>
    %cst = arith.constant dense<0.000000e+00> : vector<8x96xf32>
    %26 = tpu.matmul %24, %25, %cst {dimension_numbers = #tpu.dot_dimension_numbers<[1], [0], [0], [1], [0, 0, 1, 1], [], []>} : vector<8x16xf32>, vector<16x96xf32>, vector<8x96xf32> -> vector<8x96xf32>
    %c0_10 = arith.constant 0 : index
    %c0_11 = arith.constant 0 : index
    %27 = vector.load %arg6[%c0_10, %c0_11] : memref<1x96xf32, #tpu.memory_space<vmem>>, vector<1x96xf32>
    %28 = vector.broadcast %27 : vector<1x96xf32> to vector<8x96xf32>
    %29 = arith.addf %26, %28 : vector<8x96xf32>
    %c0_12 = arith.constant 0 : index
    %c0_13 = arith.constant 0 : index
    %30 = vector.load %arg5[%c0_12, %c0_13] : memref<32x96xf32, #tpu.memory_space<vmem>>, vector<32x96xf32>
    %c0_14 = arith.constant 0 : index
    %c0_15 = arith.constant 0 : index
    %31 = vector.load %arg7[%c0_14, %c0_15] : memref<1x96xf32, #tpu.memory_space<vmem>>, vector<1x96xf32>
    %c0_16 = arith.constant 0 : index
    %c0_17 = arith.constant 0 : index
    %32 = vector.load %arg3[%c0_16, %c0_17] : memref<1x32xf32, #tpu.memory_space<vmem>>, vector<1x32xf32>
    %33 = vector.extract_strided_slice %29 {offsets = [0, 0], sizes = [1, 96], strides = [1, 1]} : vector<8x96xf32> to vector<1x96xf32>
    %cst_18 = arith.constant dense<0.000000e+00> : vector<1x96xf32>
    %34 = tpu.matmul %32, %30, %cst_18 {dimension_numbers = #tpu.dot_dimension_numbers<[1], [0], [0], [1], [0, 0, 1, 1], [], []>} : vector<1x32xf32>, vector<32x96xf32>, vector<1x96xf32> -> vector<1x96xf32>
    %35 = arith.addf %34, %31 : vector<1x96xf32>
    %36 = vector.extract_strided_slice %33 {offsets = [0, 0], sizes = [1, 32], strides = [1, 1]} : vector<1x96xf32> to vector<1x32xf32>
    %37 = vector.extract_strided_slice %35 {offsets = [0, 0], sizes = [1, 32], strides = [1, 1]} : vector<1x96xf32> to vector<1x32xf32>
    %38 = arith.addf %36, %37 : vector<1x32xf32>
    %39 = arith.negf %38 : vector<1x32xf32>
    %40 = math.exp %39 : vector<1x32xf32>
    %cst_19 = arith.constant 1.000000e+00 : f32
    %41 = vector.broadcast %cst_19 : f32 to vector<1x32xf32>
    %42 = arith.addf %41, %40 : vector<1x32xf32>
    %43 = arith.divf %41, %42 : vector<1x32xf32>
    %44 = vector.extract_strided_slice %33 {offsets = [0, 32], sizes = [1, 32], strides = [1, 1]} : vector<1x96xf32> to vector<1x32xf32>
    %45 = vector.extract_strided_slice %35 {offsets = [0, 32], sizes = [1, 32], strides = [1, 1]} : vector<1x96xf32> to vector<1x32xf32>
    %46 = arith.addf %44, %45 : vector<1x32xf32>
    %47 = arith.negf %46 : vector<1x32xf32>
    %48 = math.exp %47 : vector<1x32xf32>
    %cst_20 = arith.constant 1.000000e+00 : f32
    %49 = vector.broadcast %cst_20 : f32 to vector<1x32xf32>
    %50 = arith.addf %49, %48 : vector<1x32xf32>
    %51 = arith.divf %49, %50 : vector<1x32xf32>
    %52 = vector.extract_strided_slice %33 {offsets = [0, 64], sizes = [1, 32], strides = [1, 1]} : vector<1x96xf32> to vector<1x32xf32>
    %53 = vector.extract_strided_slice %35 {offsets = [0, 64], sizes = [1, 32], strides = [1, 1]} : vector<1x96xf32> to vector<1x32xf32>
    %54 = arith.mulf %43, %53 : vector<1x32xf32>
    %55 = arith.addf %52, %54 : vector<1x32xf32>
    %56 = math.tanh %55 : vector<1x32xf32>
    %cst_21 = arith.constant 1.000000e+00 : f32
    %57 = vector.broadcast %cst_21 : f32 to vector<1x32xf32>
    %58 = arith.subf %57, %51 : vector<1x32xf32>
    %59 = arith.mulf %58, %56 : vector<1x32xf32>
    %60 = arith.mulf %51, %32 : vector<1x32xf32>
    %61 = arith.addf %59, %60 : vector<1x32xf32>
    %c0_22 = arith.constant 0 : index
    %c0_23 = arith.constant 0 : index
    %62 = vector.load %arg8[%c0_22, %c0_23] : memref<8x32xf32, #tpu.memory_space<vmem>>, vector<1x32xf32>
    tpu.vector_store %arg8[%c0_22, %c0_23], %61 {strides = array<i32>} : memref<8x32xf32, #tpu.memory_space<vmem>>, vector<1x32xf32>,
    %63 = vector.extract_strided_slice %29 {offsets = [1, 0], sizes = [1, 96], strides = [1, 1]} : vector<8x96xf32> to vector<1x96xf32>
    %cst_24 = arith.constant dense<0.000000e+00> : vector<1x96xf32>
    %64 = tpu.matmul %61, %30, %cst_24 {dimension_numbers = #tpu.dot_dimension_numbers<[1], [0], [0], [1], [0, 0, 1, 1], [], []>} : vector<1x32xf32>, vector<32x96xf32>, vector<1x96xf32> -> vector<1x96xf32>
    %65 = arith.addf %64, %31 : vector<1x96xf32>
    %66 = vector.extract_strided_slice %63 {offsets = [0, 0], sizes = [1, 32], strides = [1, 1]} : vector<1x96xf32> to vector<1x32xf32>
    %67 = vector.extract_strided_slice %65 {offsets = [0, 0], sizes = [1, 32], strides = [1, 1]} : vector<1x96xf32> to vector<1x32xf32>
    %68 = arith.addf %66, %67 : vector<1x32xf32>
    %69 = arith.negf %68 : vector<1x32xf32>
    %70 = math.exp %69 : vector<1x32xf32>
    %cst_25 = arith.constant 1.000000e+00 : f32
    %71 = vector.broadcast %cst_25 : f32 to vector<1x32xf32>
    %72 = arith.addf %71, %70 : vector<1x32xf32>
    %73 = arith.divf %71, %72 : vector<1x32xf32>
    %74 = vector.extract_strided_slice %63 {offsets = [0, 32], sizes = [1, 32], strides = [1, 1]} : vector<1x96xf32> to vector<1x32xf32>
    %75 = vector.extract_strided_slice %65 {offsets = [0, 32], sizes = [1, 32], strides = [1, 1]} : vector<1x96xf32> to vector<1x32xf32>
    %76 = arith.addf %74, %75 : vector<1x32xf32>
    %77 = arith.negf %76 : vector<1x32xf32>
    %78 = math.exp %77 : vector<1x32xf32>
    %cst_26 = arith.constant 1.000000e+00 : f32
    %79 = vector.broadcast %cst_26 : f32 to vector<1x32xf32>
    %80 = arith.addf %79, %78 : vector<1x32xf32>
    %81 = arith.divf %79, %80 : vector<1x32xf32>
    %82 = vector.extract_strided_slice %63 {offsets = [0, 64], sizes = [1, 32], strides = [1, 1]} : vector<1x96xf32> to vector<1x32xf32>
    %83 = vector.extract_strided_slice %65 {offsets = [0, 64], sizes = [1, 32], strides = [1, 1]} : vector<1x96xf32> to vector<1x32xf32>
    %84 = arith.mulf %73, %83 : vector<1x32xf32>
    %85 = arith.addf %82, %84 : vector<1x32xf32>
    %86 = math.tanh %85 : vector<1x32xf32>
    %cst_27 = arith.constant 1.000000e+00 : f32
    %87 = vector.broadcast %cst_27 : f32 to vector<1x32xf32>
    %88 = arith.subf %87, %81 : vector<1x32xf32>
    %89 = arith.mulf %88, %86 : vector<1x32xf32>
    %90 = arith.mulf %81, %61 : vector<1x32xf32>
    %91 = arith.addf %89, %90 : vector<1x32xf32>
    %c1_28 = arith.constant 1 : index
    %c0_29 = arith.constant 0 : index
    %92 = vector.load %arg8[%c1_28, %c0_29] : memref<8x32xf32, #tpu.memory_space<vmem>>, vector<1x32xf32>
    tpu.vector_store %arg8[%c1_28, %c0_29], %91 {strides = array<i32>} : memref<8x32xf32, #tpu.memory_space<vmem>>, vector<1x32xf32>,
    %93 = vector.extract_strided_slice %29 {offsets = [2, 0], sizes = [1, 96], strides = [1, 1]} : vector<8x96xf32> to vector<1x96xf32>
    %cst_30 = arith.constant dense<0.000000e+00> : vector<1x96xf32>
    %94 = tpu.matmul %91, %30, %cst_30 {dimension_numbers = #tpu.dot_dimension_numbers<[1], [0], [0], [1], [0, 0, 1, 1], [], []>} : vector<1x32xf32>, vector<32x96xf32>, vector<1x96xf32> -> vector<1x96xf32>
    %95 = arith.addf %94, %31 : vector<1x96xf32>
    %96 = vector.extract_strided_slice %93 {offsets = [0, 0], sizes = [1, 32], strides = [1, 1]} : vector<1x96xf32> to vector<1x32xf32>
    %97 = vector.extract_strided_slice %95 {offsets = [0, 0], sizes = [1, 32], strides = [1, 1]} : vector<1x96xf32> to vector<1x32xf32>
    %98 = arith.addf %96, %97 : vector<1x32xf32>
    %99 = arith.negf %98 : vector<1x32xf32>
    %100 = math.exp %99 : vector<1x32xf32>
    %cst_31 = arith.constant 1.000000e+00 : f32
    %101 = vector.broadcast %cst_31 : f32 to vector<1x32xf32>
    %102 = arith.addf %101, %100 : vector<1x32xf32>
    %103 = arith.divf %101, %102 : vector<1x32xf32>
    %104 = vector.extract_strided_slice %93 {offsets = [0, 32], sizes = [1, 32], strides = [1, 1]} : vector<1x96xf32> to vector<1x32xf32>
    %105 = vector.extract_strided_slice %95 {offsets = [0, 32], sizes = [1, 32], strides = [1, 1]} : vector<1x96xf32> to vector<1x32xf32>
    %106 = arith.addf %104, %105 : vector<1x32xf32>
    %107 = arith.negf %106 : vector<1x32xf32>
    %108 = math.exp %107 : vector<1x32xf32>
    %cst_32 = arith.constant 1.000000e+00 : f32
    %109 = vector.broadcast %cst_32 : f32 to vector<1x32xf32>
    %110 = arith.addf %109, %108 : vector<1x32xf32>
    %111 = arith.divf %109, %110 : vector<1x32xf32>
    %112 = vector.extract_strided_slice %93 {offsets = [0, 64], sizes = [1, 32], strides = [1, 1]} : vector<1x96xf32> to vector<1x32xf32>
    %113 = vector.extract_strided_slice %95 {offsets = [0, 64], sizes = [1, 32], strides = [1, 1]} : vector<1x96xf32> to vector<1x32xf32>
    %114 = arith.mulf %103, %113 : vector<1x32xf32>
    %115 = arith.addf %112, %114 : vector<1x32xf32>
    %116 = math.tanh %115 : vector<1x32xf32>
    %cst_33 = arith.constant 1.000000e+00 : f32
    %117 = vector.broadcast %cst_33 : f32 to vector<1x32xf32>
    %118 = arith.subf %117, %111 : vector<1x32xf32>
    %119 = arith.mulf %118, %116 : vector<1x32xf32>
    %120 = arith.mulf %111, %91 : vector<1x32xf32>
    %121 = arith.addf %119, %120 : vector<1x32xf32>
    %c2_34 = arith.constant 2 : index
    %c0_35 = arith.constant 0 : index
    %122 = vector.load %arg8[%c2_34, %c0_35] : memref<8x32xf32, #tpu.memory_space<vmem>>, vector<1x32xf32>
    tpu.vector_store %arg8[%c2_34, %c0_35], %121 {strides = array<i32>} : memref<8x32xf32, #tpu.memory_space<vmem>>, vector<1x32xf32>,
    %123 = vector.extract_strided_slice %29 {offsets = [3, 0], sizes = [1, 96], strides = [1, 1]} : vector<8x96xf32> to vector<1x96xf32>
    %cst_36 = arith.constant dense<0.000000e+00> : vector<1x96xf32>
    %124 = tpu.matmul %121, %30, %cst_36 {dimension_numbers = #tpu.dot_dimension_numbers<[1], [0], [0], [1], [0, 0, 1, 1], [], []>} : vector<1x32xf32>, vector<32x96xf32>, vector<1x96xf32> -> vector<1x96xf32>
    %125 = arith.addf %124, %31 : vector<1x96xf32>
    %126 = vector.extract_strided_slice %123 {offsets = [0, 0], sizes = [1, 32], strides = [1, 1]} : vector<1x96xf32> to vector<1x32xf32>
    %127 = vector.extract_strided_slice %125 {offsets = [0, 0], sizes = [1, 32], strides = [1, 1]} : vector<1x96xf32> to vector<1x32xf32>
    %128 = arith.addf %126, %127 : vector<1x32xf32>
    %129 = arith.negf %128 : vector<1x32xf32>
    %130 = math.exp %129 : vector<1x32xf32>
    %cst_37 = arith.constant 1.000000e+00 : f32
    %131 = vector.broadcast %cst_37 : f32 to vector<1x32xf32>
    %132 = arith.addf %131, %130 : vector<1x32xf32>
    %133 = arith.divf %131, %132 : vector<1x32xf32>
    %134 = vector.extract_strided_slice %123 {offsets = [0, 32], sizes = [1, 32], strides = [1, 1]} : vector<1x96xf32> to vector<1x32xf32>
    %135 = vector.extract_strided_slice %125 {offsets = [0, 32], sizes = [1, 32], strides = [1, 1]} : vector<1x96xf32> to vector<1x32xf32>
    %136 = arith.addf %134, %135 : vector<1x32xf32>
    %137 = arith.negf %136 : vector<1x32xf32>
    %138 = math.exp %137 : vector<1x32xf32>
    %cst_38 = arith.constant 1.000000e+00 : f32
    %139 = vector.broadcast %cst_38 : f32 to vector<1x32xf32>
    %140 = arith.addf %139, %138 : vector<1x32xf32>
    %141 = arith.divf %139, %140 : vector<1x32xf32>
    %142 = vector.extract_strided_slice %123 {offsets = [0, 64], sizes = [1, 32], strides = [1, 1]} : vector<1x96xf32> to vector<1x32xf32>
    %143 = vector.extract_strided_slice %125 {offsets = [0, 64], sizes = [1, 32], strides = [1, 1]} : vector<1x96xf32> to vector<1x32xf32>
    %144 = arith.mulf %133, %143 : vector<1x32xf32>
    %145 = arith.addf %142, %144 : vector<1x32xf32>
    %146 = math.tanh %145 : vector<1x32xf32>
    %cst_39 = arith.constant 1.000000e+00 : f32
    %147 = vector.broadcast %cst_39 : f32 to vector<1x32xf32>
    %148 = arith.subf %147, %141 : vector<1x32xf32>
    %149 = arith.mulf %148, %146 : vector<1x32xf32>
    %150 = arith.mulf %141, %121 : vector<1x32xf32>
    %151 = arith.addf %149, %150 : vector<1x32xf32>
    %c3_40 = arith.constant 3 : index
    %c0_41 = arith.constant 0 : index
    %152 = vector.load %arg8[%c3_40, %c0_41] : memref<8x32xf32, #tpu.memory_space<vmem>>, vector<1x32xf32>
    tpu.vector_store %arg8[%c3_40, %c0_41], %151 {strides = array<i32>} : memref<8x32xf32, #tpu.memory_space<vmem>>, vector<1x32xf32>,
    %153 = vector.extract_strided_slice %29 {offsets = [4, 0], sizes = [1, 96], strides = [1, 1]} : vector<8x96xf32> to vector<1x96xf32>
    %cst_42 = arith.constant dense<0.000000e+00> : vector<1x96xf32>
    %154 = tpu.matmul %151, %30, %cst_42 {dimension_numbers = #tpu.dot_dimension_numbers<[1], [0], [0], [1], [0, 0, 1, 1], [], []>} : vector<1x32xf32>, vector<32x96xf32>, vector<1x96xf32> -> vector<1x96xf32>
    %155 = arith.addf %154, %31 : vector<1x96xf32>
    %156 = vector.extract_strided_slice %153 {offsets = [0, 0], sizes = [1, 32], strides = [1, 1]} : vector<1x96xf32> to vector<1x32xf32>
    %157 = vector.extract_strided_slice %155 {offsets = [0, 0], sizes = [1, 32], strides = [1, 1]} : vector<1x96xf32> to vector<1x32xf32>
    %158 = arith.addf %156, %157 : vector<1x32xf32>
    %159 = arith.negf %158 : vector<1x32xf32>
    %160 = math.exp %159 : vector<1x32xf32>
    %cst_43 = arith.constant 1.000000e+00 : f32
    %161 = vector.broadcast %cst_43 : f32 to vector<1x32xf32>
    %162 = arith.addf %161, %160 : vector<1x32xf32>
    %163 = arith.divf %161, %162 : vector<1x32xf32>
    %164 = vector.extract_strided_slice %153 {offsets = [0, 32], sizes = [1, 32], strides = [1, 1]} : vector<1x96xf32> to vector<1x32xf32>
    %165 = vector.extract_strided_slice %155 {offsets = [0, 32], sizes = [1, 32], strides = [1, 1]} : vector<1x96xf32> to vector<1x32xf32>
    %166 = arith.addf %164, %165 : vector<1x32xf32>
    %167 = arith.negf %166 : vector<1x32xf32>
    %168 = math.exp %167 : vector<1x32xf32>
    %cst_44 = arith.constant 1.000000e+00 : f32
    %169 = vector.broadcast %cst_44 : f32 to vector<1x32xf32>
    %170 = arith.addf %169, %168 : vector<1x32xf32>
    %171 = arith.divf %169, %170 : vector<1x32xf32>
    %172 = vector.extract_strided_slice %153 {offsets = [0, 64], sizes = [1, 32], strides = [1, 1]} : vector<1x96xf32> to vector<1x32xf32>
    %173 = vector.extract_strided_slice %155 {offsets = [0, 64], sizes = [1, 32], strides = [1, 1]} : vector<1x96xf32> to vector<1x32xf32>
    %174 = arith.mulf %163, %173 : vector<1x32xf32>
    %175 = arith.addf %172, %174 : vector<1x32xf32>
    %176 = math.tanh %175 : vector<1x32xf32>
    %cst_45 = arith.constant 1.000000e+00 : f32
    %177 = vector.broadcast %cst_45 : f32 to vector<1x32xf32>
    %178 = arith.subf %177, %171 : vector<1x32xf32>
    %179 = arith.mulf %178, %176 : vector<1x32xf32>
    %180 = arith.mulf %171, %151 : vector<1x32xf32>
    %181 = arith.addf %179, %180 : vector<1x32xf32>
    %c4_46 = arith.constant 4 : index
    %c0_47 = arith.constant 0 : index
    %182 = vector.load %arg8[%c4_46, %c0_47] : memref<8x32xf32, #tpu.memory_space<vmem>>, vector<1x32xf32>
    tpu.vector_store %arg8[%c4_46, %c0_47], %181 {strides = array<i32>} : memref<8x32xf32, #tpu.memory_space<vmem>>, vector<1x32xf32>,
    %183 = vector.extract_strided_slice %29 {offsets = [5, 0], sizes = [1, 96], strides = [1, 1]} : vector<8x96xf32> to vector<1x96xf32>
    %cst_48 = arith.constant dense<0.000000e+00> : vector<1x96xf32>
    %184 = tpu.matmul %181, %30, %cst_48 {dimension_numbers = #tpu.dot_dimension_numbers<[1], [0], [0], [1], [0, 0, 1, 1], [], []>} : vector<1x32xf32>, vector<32x96xf32>, vector<1x96xf32> -> vector<1x96xf32>
    %185 = arith.addf %184, %31 : vector<1x96xf32>
    %186 = vector.extract_strided_slice %183 {offsets = [0, 0], sizes = [1, 32], strides = [1, 1]} : vector<1x96xf32> to vector<1x32xf32>
    %187 = vector.extract_strided_slice %185 {offsets = [0, 0], sizes = [1, 32], strides = [1, 1]} : vector<1x96xf32> to vector<1x32xf32>
    %188 = arith.addf %186, %187 : vector<1x32xf32>
    %189 = arith.negf %188 : vector<1x32xf32>
    %190 = math.exp %189 : vector<1x32xf32>
    %cst_49 = arith.constant 1.000000e+00 : f32
    %191 = vector.broadcast %cst_49 : f32 to vector<1x32xf32>
    %192 = arith.addf %191, %190 : vector<1x32xf32>
    %193 = arith.divf %191, %192 : vector<1x32xf32>
    %194 = vector.extract_strided_slice %183 {offsets = [0, 32], sizes = [1, 32], strides = [1, 1]} : vector<1x96xf32> to vector<1x32xf32>
    %195 = vector.extract_strided_slice %185 {offsets = [0, 32], sizes = [1, 32], strides = [1, 1]} : vector<1x96xf32> to vector<1x32xf32>
    %196 = arith.addf %194, %195 : vector<1x32xf32>
    %197 = arith.negf %196 : vector<1x32xf32>
    %198 = math.exp %197 : vector<1x32xf32>
    %cst_50 = arith.constant 1.000000e+00 : f32
    %199 = vector.broadcast %cst_50 : f32 to vector<1x32xf32>
    %200 = arith.addf %199, %198 : vector<1x32xf32>
    %201 = arith.divf %199, %200 : vector<1x32xf32>
    %202 = vector.extract_strided_slice %183 {offsets = [0, 64], sizes = [1, 32], strides = [1, 1]} : vector<1x96xf32> to vector<1x32xf32>
    %203 = vector.extract_strided_slice %185 {offsets = [0, 64], sizes = [1, 32], strides = [1, 1]} : vector<1x96xf32> to vector<1x32xf32>
    %204 = arith.mulf %193, %203 : vector<1x32xf32>
    %205 = arith.addf %202, %204 : vector<1x32xf32>
    %206 = math.tanh %205 : vector<1x32xf32>
    %cst_51 = arith.constant 1.000000e+00 : f32
    %207 = vector.broadcast %cst_51 : f32 to vector<1x32xf32>
    %208 = arith.subf %207, %201 : vector<1x32xf32>
    %209 = arith.mulf %208, %206 : vector<1x32xf32>
    %210 = arith.mulf %201, %181 : vector<1x32xf32>
    %211 = arith.addf %209, %210 : vector<1x32xf32>
    %c5_52 = arith.constant 5 : index
    %c0_53 = arith.constant 0 : index
    %212 = vector.load %arg8[%c5_52, %c0_53] : memref<8x32xf32, #tpu.memory_space<vmem>>, vector<1x32xf32>
    tpu.vector_store %arg8[%c5_52, %c0_53], %211 {strides = array<i32>} : memref<8x32xf32, #tpu.memory_space<vmem>>, vector<1x32xf32>,
    %213 = vector.extract_strided_slice %29 {offsets = [6, 0], sizes = [1, 96], strides = [1, 1]} : vector<8x96xf32> to vector<1x96xf32>
    %cst_54 = arith.constant dense<0.000000e+00> : vector<1x96xf32>
    %214 = tpu.matmul %211, %30, %cst_54 {dimension_numbers = #tpu.dot_dimension_numbers<[1], [0], [0], [1], [0, 0, 1, 1], [], []>} : vector<1x32xf32>, vector<32x96xf32>, vector<1x96xf32> -> vector<1x96xf32>
    %215 = arith.addf %214, %31 : vector<1x96xf32>
    %216 = vector.extract_strided_slice %213 {offsets = [0, 0], sizes = [1, 32], strides = [1, 1]} : vector<1x96xf32> to vector<1x32xf32>
    %217 = vector.extract_strided_slice %215 {offsets = [0, 0], sizes = [1, 32], strides = [1, 1]} : vector<1x96xf32> to vector<1x32xf32>
    %218 = arith.addf %216, %217 : vector<1x32xf32>
    %219 = arith.negf %218 : vector<1x32xf32>
    %220 = math.exp %219 : vector<1x32xf32>
    %cst_55 = arith.constant 1.000000e+00 : f32
    %221 = vector.broadcast %cst_55 : f32 to vector<1x32xf32>
    %222 = arith.addf %221, %220 : vector<1x32xf32>
    %223 = arith.divf %221, %222 : vector<1x32xf32>
    %224 = vector.extract_strided_slice %213 {offsets = [0, 32], sizes = [1, 32], strides = [1, 1]} : vector<1x96xf32> to vector<1x32xf32>
    %225 = vector.extract_strided_slice %215 {offsets = [0, 32], sizes = [1, 32], strides = [1, 1]} : vector<1x96xf32> to vector<1x32xf32>
    %226 = arith.addf %224, %225 : vector<1x32xf32>
    %227 = arith.negf %226 : vector<1x32xf32>
    %228 = math.exp %227 : vector<1x32xf32>
    %cst_56 = arith.constant 1.000000e+00 : f32
    %229 = vector.broadcast %cst_56 : f32 to vector<1x32xf32>
    %230 = arith.addf %229, %228 : vector<1x32xf32>
    %231 = arith.divf %229, %230 : vector<1x32xf32>
    %232 = vector.extract_strided_slice %213 {offsets = [0, 64], sizes = [1, 32], strides = [1, 1]} : vector<1x96xf32> to vector<1x32xf32>
    %233 = vector.extract_strided_slice %215 {offsets = [0, 64], sizes = [1, 32], strides = [1, 1]} : vector<1x96xf32> to vector<1x32xf32>
    %234 = arith.mulf %223, %233 : vector<1x32xf32>
    %235 = arith.addf %232, %234 : vector<1x32xf32>
    %236 = math.tanh %235 : vector<1x32xf32>
    %cst_57 = arith.constant 1.000000e+00 : f32
    %237 = vector.broadcast %cst_57 : f32 to vector<1x32xf32>
    %238 = arith.subf %237, %231 : vector<1x32xf32>
    %239 = arith.mulf %238, %236 : vector<1x32xf32>
    %240 = arith.mulf %231, %211 : vector<1x32xf32>
    %241 = arith.addf %239, %240 : vector<1x32xf32>
    %c6_58 = arith.constant 6 : index
    %c0_59 = arith.constant 0 : index
    %242 = vector.load %arg8[%c6_58, %c0_59] : memref<8x32xf32, #tpu.memory_space<vmem>>, vector<1x32xf32>
    tpu.vector_store %arg8[%c6_58, %c0_59], %241 {strides = array<i32>} : memref<8x32xf32, #tpu.memory_space<vmem>>, vector<1x32xf32>,
    %243 = vector.extract_strided_slice %29 {offsets = [7, 0], sizes = [1, 96], strides = [1, 1]} : vector<8x96xf32> to vector<1x96xf32>
    %cst_60 = arith.constant dense<0.000000e+00> : vector<1x96xf32>
    %244 = tpu.matmul %241, %30, %cst_60 {dimension_numbers = #tpu.dot_dimension_numbers<[1], [0], [0], [1], [0, 0, 1, 1], [], []>} : vector<1x32xf32>, vector<32x96xf32>, vector<1x96xf32> -> vector<1x96xf32>
    %245 = arith.addf %244, %31 : vector<1x96xf32>
    %246 = vector.extract_strided_slice %243 {offsets = [0, 0], sizes = [1, 32], strides = [1, 1]} : vector<1x96xf32> to vector<1x32xf32>
    %247 = vector.extract_strided_slice %245 {offsets = [0, 0], sizes = [1, 32], strides = [1, 1]} : vector<1x96xf32> to vector<1x32xf32>
    %248 = arith.addf %246, %247 : vector<1x32xf32>
    %249 = arith.negf %248 : vector<1x32xf32>
    %250 = math.exp %249 : vector<1x32xf32>
    %cst_61 = arith.constant 1.000000e+00 : f32
    %251 = vector.broadcast %cst_61 : f32 to vector<1x32xf32>
    %252 = arith.addf %251, %250 : vector<1x32xf32>
    %253 = arith.divf %251, %252 : vector<1x32xf32>
    %254 = vector.extract_strided_slice %243 {offsets = [0, 32], sizes = [1, 32], strides = [1, 1]} : vector<1x96xf32> to vector<1x32xf32>
    %255 = vector.extract_strided_slice %245 {offsets = [0, 32], sizes = [1, 32], strides = [1, 1]} : vector<1x96xf32> to vector<1x32xf32>
    %256 = arith.addf %254, %255 : vector<1x32xf32>
    %257 = arith.negf %256 : vector<1x32xf32>
    %258 = math.exp %257 : vector<1x32xf32>
    %cst_62 = arith.constant 1.000000e+00 : f32
    %259 = vector.broadcast %cst_62 : f32 to vector<1x32xf32>
    %260 = arith.addf %259, %258 : vector<1x32xf32>
    %261 = arith.divf %259, %260 : vector<1x32xf32>
    %262 = vector.extract_strided_slice %243 {offsets = [0, 64], sizes = [1, 32], strides = [1, 1]} : vector<1x96xf32> to vector<1x32xf32>
    %263 = vector.extract_strided_slice %245 {offsets = [0, 64], sizes = [1, 32], strides = [1, 1]} : vector<1x96xf32> to vector<1x32xf32>
    %264 = arith.mulf %253, %263 : vector<1x32xf32>
    %265 = arith.addf %262, %264 : vector<1x32xf32>
    %266 = math.tanh %265 : vector<1x32xf32>
    %cst_63 = arith.constant 1.000000e+00 : f32
    %267 = vector.broadcast %cst_63 : f32 to vector<1x32xf32>
    %268 = arith.subf %267, %261 : vector<1x32xf32>
    %269 = arith.mulf %268, %266 : vector<1x32xf32>
    %270 = arith.mulf %261, %241 : vector<1x32xf32>
    %271 = arith.addf %269, %270 : vector<1x32xf32>
    %c7_64 = arith.constant 7 : index
    %c0_65 = arith.constant 0 : index
    %272 = vector.load %arg8[%c7_64, %c0_65] : memref<8x32xf32, #tpu.memory_space<vmem>>, vector<1x32xf32>
    tpu.vector_store %arg8[%c7_64, %c0_65], %271 {strides = array<i32>} : memref<8x32xf32, #tpu.memory_space<vmem>>, vector<1x32xf32>,
    %c0_66 = arith.constant 0 : index
    %c0_67 = arith.constant 0 : index
    %273 = vector.load %arg9[%c0_66, %c0_67] : memref<1x32xf32, #tpu.memory_space<vmem>>, vector<1x32xf32>
    tpu.vector_store %arg9[%c0_66, %c0_67], %271 {strides = array<i32>} : memref<1x32xf32, #tpu.memory_space<vmem>>, vector<1x32xf32>,
    return
  }
  func.func @transform_0(%arg0: i32, %arg1: memref<8xi32, #tpu.memory_space<smem>>) -> (i32, i32) {
    %c0_i32 = arith.constant 0 : i32
    %c0_i32_0 = arith.constant 0 : i32
    %c0_i32_1 = arith.constant 0 : i32
    return %c0_i32, %c0_i32_0 : i32, i32
  }
  func.func @transform_1(%arg0: i32, %arg1: memref<8xi32, #tpu.memory_space<smem>>) -> (i32, i32) {
    %c0_i32 = arith.constant 0 : i32
    %c0_i32_0 = arith.constant 0 : i32
    %c0_i32_1 = arith.constant 0 : i32
    return %c0_i32, %c0_i32_0 : i32, i32
  }
  func.func @transform_2(%arg0: i32, %arg1: memref<8xi32, #tpu.memory_space<smem>>) -> (i32, i32) {
    %c0_i32 = arith.constant 0 : i32
    %c0_i32_0 = arith.constant 0 : i32
    %c0_i32_1 = arith.constant 0 : i32
    return %c0_i32, %c0_i32_0 : i32, i32
  }
  func.func @transform_3(%arg0: i32, %arg1: memref<8xi32, #tpu.memory_space<smem>>) -> (i32, i32) {
    %c0_i32 = arith.constant 0 : i32
    %c0_i32_0 = arith.constant 0 : i32
    %c0_i32_1 = arith.constant 0 : i32
    return %c0_i32, %c0_i32_0 : i32, i32
  }
  func.func @transform_4(%arg0: i32, %arg1: memref<8xi32, #tpu.memory_space<smem>>) -> (i32, i32) {
    %c0_i32 = arith.constant 0 : i32
    %c0_i32_0 = arith.constant 0 : i32
    %c0_i32_1 = arith.constant 0 : i32
    return %c0_i32, %c0_i32_0 : i32, i32
  }
  func.func @transform_5(%arg0: i32, %arg1: memref<8xi32, #tpu.memory_space<smem>>) -> (i32, i32) {
    %c0_i32 = arith.constant 0 : i32
    %c0_i32_0 = arith.constant 0 : i32
    %c0_i32_1 = arith.constant 0 : i32
    return %c0_i32, %c0_i32_0 : i32, i32
  }
  func.func @transform_6(%arg0: i32, %arg1: memref<8xi32, #tpu.memory_space<smem>>) -> (i32, i32) {
    %c0_i32 = arith.constant 0 : i32
    %c0_i32_0 = arith.constant 0 : i32
    %c0_i32_1 = arith.constant 0 : i32
    return %c0_i32, %c0_i32_0 : i32, i32
  }
  func.func @transform_7(%arg0: i32, %arg1: memref<8xi32, #tpu.memory_space<smem>>) -> (i32, i32) {
    %c0_i32 = arith.constant 0 : i32
    %c0_i32_0 = arith.constant 0 : i32
    %c0_i32_1 = arith.constant 0 : i32
    return %c0_i32, %c0_i32_0 : i32, i32
  }
}

</mosaic_0001>

<bundles_post_ra>
// kernel: encoder_forward_seq.1
= control target key start
LH: loop header
LB: loop body
LE: loop exit
PB: predicated region body
PF: predicated region fallthrough
CT: control target
= control target key end

     0   :  { %s1742_s0 = inlined_call_operand.vmem [shape: s32[8], index: 0, kind: input, shape index: {}]   ;;  %s1743_s1 = inlined_call_operand.vmem [shape: f32[50,16], index: 1, kind: input, shape index: {}]   ;;  %s1744_s2 = inlined_call_operand.vmem [shape: f32[1,32], index: 2, kind: input, shape index: {}]   ;;  %s1745_s3 = inlined_call_operand.vmem [shape: f32[16,96], index: 3, kind: input, shape index: {}]   ;;  %s1746_s4 = inlined_call_operand.vmem [shape: f32[32,96], index: 4, kind: input, shape index: {}]   ;;  %s1747_s5 = inlined_call_operand.vmem [shape: f32[1,96], index: 5, kind: input, shape index: {}]   ;;  %s1748_s6 = inlined_call_operand.vmem [shape: f32[1,96], index: 6, kind: input, shape index: {}]   ;;  %s1749_s7 = inlined_call_operand.hbm [shape: f32[8,32], index: 7, kind: output, shape index: {0}]   ;;  %s1750_s8 = inlined_call_operand.hbm [shape: f32[1,32], index: 8, kind: output, shape index: {1}]  }
   0x1   :  { %s14_s29 = sshll.u32 %s1742_s0, 4  ;;  %s15_s29 = int_to_ptr.vmem [resolvable:$true] %s14_s29 }
   0x2   :  { %s1377_s30 = scalar_lea.vmem %s15_s29, 16  ;;  %p1382_p1 = scmp.lt.s32.totalorder %s15_s29, %s15_s29 }
   0x3   :  { %p1378_p0 = scmp.ne.s32.totalorder %s15_s29, %s1377_s30  ;;  %p1383_p2 = scmp.lt.s32.totalorder %s1377_s30, %s1377_s30 }
   0x5   :  { %p1384_p3 = por %p1383_p2, %p1382_p1 }
   0x7   :  { %p1385_p4 = pnand %p1384_p3, %p1378_p0 }
   0x9   :  { %1388 = shalt.err (!%p1385_p4)  }
   0xa   :  { %s1439_s9 = smov [#allocation3]  }
   0xb   :  { %17 = dma.vmem_to_smem %s15_s29, 16, %s1439_s9, [#allocation2] }
   0xc   :  { %1433 = dma.done.wait [#allocation2], 16 }
   0xd   :  { %1434 = vsyncadd [#allocation2], 4294967280 }
   0xe   :  { %19 = sfence }
   0xf   :  { %20 = vsyncpa [#allocation5], 0  ;;  %v176_v0 = vld [vmem:[%s1746_s4] sm:$0xff]  ;;  %v177_v1 = vld [vmem:[%s1746_s4 + $0x8] sm:$0xff]  ;;  %v1440_v3 = vmov 0.0|0.0   ;;  %vm1441_vm0 = vmmov 0  }
  0x10   :  { %v178_v2 = vld [vmem:[%s1746_s4 + $0x10] sm:$0xff]  ;;  %1272 = vmatprep.subr.bf16.mxu1 %v1440_v3  ;;  %v1506_v4 = vpack.c.bf16 %v177_v1, %v176_v0  ;;  %v179_v5 = vld [vmem:[%s1746_s4 + $0x18] sm:$0xff]  ;;  %v1442_v6 = vmov 0.0   ;;  %v93_v7 = vld [vmem:[%s1745_s3] sm:$0xff]  ;;  %1269 = vmatprep.subr.bf16.mxu0 %v1440_v3  ;;  %s34_s21 = sld [smem:[#allocation3]]  ;;  %s1106_s4 = sld [smem:[#allocation3 + $0x1]] }
  0x11   :  { %1189 = vmatprep.mubr.msk.f32.mxu1 %vm1441_vm0, %v1442_v6  ;;  %v94_v8 = vld [vmem:[%s1745_s3 + $0x8] sm:$0xff]  ;;  %1178 = vmatprep.mubr.msk.f32.mxu0 %vm1441_vm0, %v1442_v6  ;;  %v1523_v9 = vpack.c.bf16 %v179_v5, %v178_v2  ;;  %s1107_s22 = sld [smem:[#allocation3 + $0x2]]  ;;  %s1108_s23 = sld [smem:[#allocation3 + $0x3]] }
  0x12   :  { %1274 = vmatpush3.bf16.msra.mxu1 %v1506_v4  ;;  %v1270_v10 = vpack.c.bf16 %v94_v8, %v93_v7  ;;  %s1109_s24 = sld [smem:[#allocation3 + $0x4]]  ;;  %s1110_s25 = sld [smem:[#allocation3 + $0x5]] }
  0x13   :  { %1275 = vmatprep.subr.bf16.mxu1 %v1440_v3  ;;  %s1526_s26 = sld [smem:[#allocation3 + $0x6]]  ;;  %s1528_s3 = sld [smem:[#allocation3 + $0x7]] }
  0x14   :  { %1271 = vmatpush3.bf16.msra.mxu0 %v1270_v10 }
  0x15   :  { %1278 = vmatprep.subr.bf16.mxu0 %v1440_v3 }
  0x16   :  { %21 = vsyncpa [#allocation7], 0  ;;  %1277 = vmatpush3.bf16.msra.mxu1 %v1523_v9  ;;  %v1535_v11 = vld [vmem:[%s1744_s2] sm:$0x1]  ;;  %vm182_vm1 = vcmask 261120   ;;  %s35_s9 = scalar_lea.vmem %s1743_s1, %s34_s21  ;;  %s38_s12 = scalar_lea.vmem %s1743_s1, %s1106_s4  ;;  %vm79_vm2 = vcmask 1040384   ;;  %v280_v51 = vlaneseq }
  0x17   :  { %1284 = vmatprep.subr.bf16.mxu1 %v1440_v3  ;;  %v36_v12 = vld [vmem:[%s35_s9] sm:$0x1]  ;;  %s41_s2 = scalar_lea.vmem %s1743_s1, %s1107_s22  ;;  %s44_s16 = scalar_lea.vmem %s1743_s1, %s1108_s23  ;;  %vm81_vm3 = vcmask 1041408   ;;  %vm83_vm4 = vcmask 1042432   ;;  %vm85_vm5 = vcmask 1043456   ;;  %vm87_vm6 = vcmask 1044480  }
  0x18   :  { %v39_v13 = vld [vmem:[%s38_s12] sm:$0x1]  ;;  %s47_s19 = scalar_lea.vmem %s1743_s1, %s1109_s24  ;;  %s50_s4 = scalar_lea.vmem %s1743_s1, %s1110_s25  ;;  %vm89_vm7 = vcmask 1045504   ;;  %vm91_vm8 = vcmask 1046528   ;;  %vm102_vm9 = vcmask 130048   ;;  %v281_v52 = vshrl.u32 %v280_v51, 7 }
  0x19   :  { %1190 = vmatmul.mubr.msk.f32.vlgmr.msra.gmra.mrb[0].mxu1 %vm182_vm1, %v1535_v11  ;;  %v42_v14 = vld [vmem:[%s41_s2] sm:$0x1]  ;;  %v59_v16 = vrot.slane %v39_v13, 7  ;;  %s53_s27 = scalar_lea.vmem %s1743_s1, %s1526_s26  ;;  %s56_s30 = scalar_lea.vmem %s1743_s1, %s1528_s3  ;;  %vm293_vm10 = vcmask 253952   ;;  %vm401_vm11 = vcmask 254977   ;;  %vm623_vm12 = vcmask 257027  }
  0x1a   :  { %v45_v15 = vld [vmem:[%s44_s16] sm:$0x1]  ;;  %v62_v19 = vrot.slane %v42_v14, 6  ;;  %1286 = vmatpush3.bf16.msra.mxu1 %v1506_v4  ;;  %1211 = vmatprep.mubr.msk.f32.mxu1 %vm1441_vm0, %v1442_v6  ;;  %s1443_s25 = smov 64   ;;  %v282_v53 = vsub.s32 0, %v281_v52  ;;  %vm845_vm13 = vcmask 259077  }
  0x1b   :  { %v48_v17 = vld [vmem:[%s47_s19] sm:$0x1]  ;;  %v65_v20 = vrot.slane %v45_v15, 5  ;;  %v80_v25 = vsel %vm79_vm2, %v36_v12, %v59_v16  ;;  %1287 = vmatprep.subr.bf16.mxu1 %v1440_v3  ;;  %vm512_vm14 = vcmask 256002   ;;  %vm734_vm15 = vcmask 258052   ;;  %s1446_s9 = smov [#allocation4]  }
  0x1c   :  { %v51_v18 = vld [vmem:[%s50_s4] sm:$0x1]  ;;  %v68_v23 = vrot.slane %v48_v17, 4  ;;  %v82_v27 = vsel %vm81_vm3, %v80_v25, %v62_v19  ;;  %v283_v55 = vrot.slane %v1535_v11, %v282_v53  ;;  %s1076_s10 = sshll.u32 %s1446_s9, 4  ;;  %s1447_s11 = smov [#allocation6]   ;;  %s1077_s10 = int_to_ptr.vmem [resolvable:$true] %s1076_s10 }
  0x1d   :  { %v54_v21 = vld [vmem:[%s53_s27] sm:$0x1]  ;;  %v71_v24 = vrot.slane %v51_v18, 3  ;;  %v84_v29 = vsel %vm83_vm4, %v82_v27, %v65_v20  ;;  %s1086_s12 = sshll.u32 %s1447_s11, 4  ;;  %s1389_s0 = scalar_lea.vmem %s1077_s10, 128  ;;  %s1710_s12 = int_to_ptr.vmem [resolvable:$true] %s1086_s12 }
  0x1e   :  { %v57_v22 = vld [vmem:[%s56_s30] sm:$0x1]  ;;  %v74_v26 = vrot.slane %v54_v21, 2  ;;  %v86_v30 = vsel %vm85_vm5, %v84_v29, %v68_v23  ;;  %1289 = vmatpush3.bf16.msra.mxu1 %v1523_v9  ;;  %p1390_p5 = scmp.ne.s32.totalorder %s1077_s10, %s1389_s0  ;;  %p1394_p6 = scmp.lt.s32.totalorder %s1077_s10, %s1077_s10 }
  0x1f   :  { %v77_v28 = vrot.slane %v57_v22, 1  ;;  %v88_v31 = vsel %vm87_vm6, %v86_v30, %v71_v24  ;;  %1296 = vmatprep.subr.bf16.mxu1 %v1440_v3  ;;  %v1585_v34 = vld [vmem:[%s1748_s6] sm:$0x1]  ;;  %s1445_s6 = smov 32   ;;  %p1395_p7 = scmp.lt.s32.totalorder %s1389_s0, %s1389_s0 }
  0x20   :  { %v90_v32 = vsel %vm89_vm7, %v88_v31, %v74_v26  ;;  %v1113_v40 = vld [vmem:[%s1747_s5] ss:$0 sm:$0xff]  ;;  %s1444_s5 = smov 96  }
  0x21   :  { %v92_v33 = vsel %vm91_vm8, %v90_v32, %v77_v28  ;;  %p1396_p8 = por %p1395_p7, %p1394_p6 }
  0x22   :  { %1179 = vmatmul.mubr.msk.f32.vlgmr.msra.gmra.mrb[0].mxu0 %vm102_vm9, %v92_v33 }
  0x23   :  { %1280 = vmatpush3.bf16.msra.mxu0 %v1506_v4  ;;  %1200 = vmatprep.mubr.msk.f32.mxu0 %vm1441_vm0, %v1442_v6  ;;  %p1397_p9 = pnand %p1396_p8, %p1390_p5 }
  0x24   :  { %1281 = vmatprep.subr.bf16.mxu0 %v1440_v3 }
  0x27   :  { %1283 = vmatpush3.bf16.msra.mxu0 %v1523_v9 }
  0x28   :  { %1290 = vmatprep.subr.bf16.mxu0 %v1440_v3 }
  0xec   :  { %v252_v35 = vpop.f32.mrb[0].mxu1 }
  0xed   :  { %v253_v36 = vadd.f32 %v252_v35, %v1585_v34  ;;  %v1191_v37 = vpop.f32.mrb[1].mxu1 }
  0xef   :  { %264 = vrot.lane.b32.xlu0 %v253_v36, %s1443_s25 }
  0xf5   :  { %v172_v38 = vpop.f32.mrb[0].mxu0 }
  0xf6   :  { %v1180_v39 = vpop.f32.mrb[1].mxu0  ;;  %v1592_v41 = vadd.f32 %v1113_v40, %v172_v38 }
  0xf8   :  { %v256_v42 = vadd.f32 %v253_v36, %v1592_v41 }
  0xfa   :  { %v1116_v43 = vmul.f32 -1.442695, %v256_v42 }
  0xfc   :  { %1329 = vpow2.f32 %v1116_v43 }
 0x106   :  { %v1330_v44 = vpop.eup %1329 }
 0x107   :  { %v260_v45 = vadd.f32 1.0, %v1330_v44 }
 0x109   :  { %1331 = vrcp.f32 %v260_v45 }
 0x113   :  { %v1332_v46 = vpop.eup %1331 }
 0x114   :  { %v274_v57 = vsub.f32 1.0, %v1332_v46 }
 0x161   :  { %v265_v47 = vpop.permute.xlu0 %264 }
 0x162   :  { %v267_v48 = vmul.f32 %v1332_v46, %v265_v47 }
 0x164   :  { %269 = vrot.lane.b32.xlu0 %v267_v48, %s1443_s25 }
 0x1d6   :  { %v270_v49 = vpop.permute.xlu0 %269 }
 0x1d7   :  { %v272_v50 = vadd.f32 %v270_v49, %v1592_v41 }
 0x1d9   :  { %1333 = vtanh.f32 %v272_v50 }
 0x1e3   :  { %v1334_v54 = vpop.eup %1333 }
 0x1e4   :  { %276 = vrot.lane.b32.xlu1 %v1334_v54, %s1444_s5 }
 0x1e8   :  { %284 = vrot.lane.b32.xlu1 %v283_v55, %s1445_s6 }
 0x256   :  { %v277_v56 = vpop.permute.xlu1 %276 }
 0x257   :  { %v279_v59 = vmul.f32 %v277_v56, %v274_v57 }
 0x25a   :  { %v285_v58 = vpop.permute.xlu1 %284 }
 0x25b   :  { %v287_v60 = vmul.f32 %v1332_v46, %v285_v58 }
 0x25d   :  { %v288_v61 = vadd.f32 %v287_v60, %v279_v59 }
 0x25f   :  { %290 = vrot.lane.b32.xlu0 %v288_v61, %s1444_s5  ;;  %v393_v17 = vrot.slane %v288_v61, 7 }
 0x2d1   :  { %v291_v62 = vpop.permute.xlu0 %290 }
 0x2d2   :  { %294 = vst.msk [vmem:[#allocation4] sm:$0x1] %vm293_vm10, %v291_v62  ;;  %1201 = vmatmul.mubr.msk.f32.vlgmr.msra.gmra.mrb[2].mxu0 %vm182_vm1, %v291_v62 }
 0x2d3   :  { %1292 = vmatpush3.bf16.msra.mxu0 %v1506_v4  ;;  %1222 = vmatprep.mubr.msk.f32.mxu0 %vm1441_vm0, %v1442_v6 }
 0x2d4   :  { %1293 = vmatprep.subr.bf16.mxu0 %v1440_v3 }
 0x2d7   :  { %1295 = vmatpush3.bf16.msra.mxu0 %v1523_v9 }
 0x2d8   :  { %1302 = vmatprep.subr.bf16.mxu0 %v1440_v3 }
 0x3a5   :  { %v363_v63 = vpop.f32.mrb[2].mxu0 }
 0x3a6   :  { %v364_v0 = vadd.f32 %v363_v63, %v1585_v34  ;;  %v1202_v1 = vpop.f32.mrb[3].mxu0 }
 0x3a8   :  { %v368_v2 = vrot.slane %v364_v0, 7 }
 0x3aa   :  { %377 = vrot.lane.b32.xlu1 %v368_v2, %s1443_s25  ;;  %v370_v5 = vadd.f32 %v368_v2, %v1592_v41 }
 0x3ac   :  { %v1118_v7 = vmul.f32 -1.442695, %v370_v5 }
 0x3ae   :  { %1335 = vpow2.f32 %v1118_v7 }
 0x3b8   :  { %v1336_v8 = vpop.eup %1335 }
 0x3b9   :  { %v374_v10 = vadd.f32 1.0, %v1336_v8 }
 0x3bb   :  { %1337 = vrcp.f32 %v374_v10 }
 0x3c5   :  { %v1338_v11 = vpop.eup %1337 }
 0x3c6   :  { %v387_v18 = vsub.f32 1.0, %v1338_v11  ;;  %v395_v20 = vmul.f32 %v1338_v11, %v393_v17 }
 0x41c   :  { %v378_v12 = vpop.permute.xlu1 %377 }
 0x41d   :  { %v380_v13 = vmul.f32 %v1338_v11, %v378_v12 }
 0x41f   :  { %382 = vrot.lane.b32.xlu0 %v380_v13, %s1443_s25 }
 0x491   :  { %v383_v14 = vpop.permute.xlu0 %382 }
 0x492   :  { %v385_v15 = vadd.f32 %v383_v14, %v1592_v41 }
 0x494   :  { %1339 = vtanh.f32 %v385_v15 }
 0x49e   :  { %v1340_v16 = vpop.eup %1339 }
 0x49f   :  { %389 = vrot.lane.b32.xlu1 %v1340_v16, %s1444_s5 }
 0x511   :  { %v390_v19 = vpop.permute.xlu1 %389 }
 0x512   :  { %v392_v21 = vmul.f32 %v390_v19, %v387_v18 }
 0x514   :  { %v1613_v22 = vadd.f32 %v395_v20, %v392_v21 }
 0x516   :  { %v403_v23 = vrot.slane %v1613_v22, 1  ;;  %v504_v42 = vrot.slane %v1613_v22, 7 }
 0x518   :  { %404 = vrot.lane.b32.xlu0 %v403_v23, %s1444_s5 }
 0x58a   :  { %v405_v24 = vpop.permute.xlu0 %404 }
 0x58b   :  { %1212 = vmatmul.mubr.msk.f32.vlgmr.msra.gmra.mrb[2].mxu1 %vm182_vm1, %v405_v24 }
 0x58c   :  { %1298 = vmatpush3.bf16.msra.mxu1 %v1506_v4  ;;  %1233 = vmatprep.mubr.msk.f32.mxu1 %vm1441_vm0, %v1442_v6 }
 0x58d   :  { %1299 = vmatprep.subr.bf16.mxu1 %v1440_v3 }
 0x590   :  { %1301 = vmatpush3.bf16.msra.mxu1 %v1523_v9 }
 0x591   :  { %1308 = vmatprep.subr.bf16.mxu1 %v1440_v3 }
 0x65e   :  { %v474_v25 = vpop.f32.mrb[2].mxu1 }
 0x65f   :  { %v475_v26 = vadd.f32 %v474_v25, %v1585_v34  ;;  %v1213_v27 = vpop.f32.mrb[3].mxu1 }
 0x661   :  { %v479_v28 = vrot.slane %v475_v26, 6 }
 0x663   :  { %488 = vrot.lane.b32.xlu1 %v479_v28, %s1443_s25  ;;  %v481_v29 = vadd.f32 %v479_v28, %v1592_v41 }
 0x665   :  { %v1120_v30 = vmul.f32 -1.442695, %v481_v29 }
 0x667   :  { %1341 = vpow2.f32 %v1120_v30 }
 0x671   :  { %v1342_v31 = vpop.eup %1341 }
 0x672   :  { %v485_v32 = vadd.f32 1.0, %v1342_v31 }
 0x674   :  { %1343 = vrcp.f32 %v485_v32 }
 0x67e   :  { %v1344_v33 = vpop.eup %1343 }
 0x67f   :  { %v498_v40 = vsub.f32 1.0, %v1344_v33  ;;  %v506_v44 = vmul.f32 %v1344_v33, %v504_v42 }
 0x6d5   :  { %v489_v35 = vpop.permute.xlu1 %488 }
 0x6d6   :  { %v491_v36 = vmul.f32 %v1344_v33, %v489_v35 }
 0x6d8   :  { %493 = vrot.lane.b32.xlu0 %v491_v36, %s1443_s25 }
 0x74a   :  { %v494_v37 = vpop.permute.xlu0 %493 }
 0x74b   :  { %v496_v38 = vadd.f32 %v494_v37, %v1592_v41 }
 0x74d   :  { %1345 = vtanh.f32 %v496_v38 }
 0x757   :  { %v1346_v39 = vpop.eup %1345 }
 0x758   :  { %500 = vrot.lane.b32.xlu1 %v1346_v39, %s1444_s5 }
 0x7ca   :  { %v501_v43 = vpop.permute.xlu1 %500 }
 0x7cb   :  { %v503_v45 = vmul.f32 %v501_v43, %v498_v40 }
 0x7cd   :  { %v1631_v46 = vadd.f32 %v506_v44, %v503_v45 }
 0x7cf   :  { %v514_v47 = vrot.slane %v1631_v46, 2  ;;  %v615_v0 = vrot.slane %v1631_v46, 7 }
 0x7d1   :  { %515 = vrot.lane.b32.xlu0 %v514_v47, %s1444_s5 }
 0x843   :  { %v516_v48 = vpop.permute.xlu0 %515 }
 0x844   :  { %1223 = vmatmul.mubr.msk.f32.vlgmr.msra.gmra.mrb[4].mxu0 %vm182_vm1, %v516_v48 }
 0x845   :  { %1304 = vmatpush3.bf16.msra.mxu0 %v1506_v4  ;;  %1244 = vmatprep.mubr.msk.f32.mxu0 %vm1441_vm0, %v1442_v6 }
 0x846   :  { %1305 = vmatprep.subr.bf16.mxu0 %v1440_v3 }
 0x849   :  { %1307 = vmatpush3.bf16.msra.mxu0 %v1523_v9 }
 0x84a   :  { %1314 = vmatprep.subr.bf16.mxu0 %v1440_v3 }
 0x917   :  { %v585_v49 = vpop.f32.mrb[4].mxu0 }
 0x918   :  { %v586_v50 = vadd.f32 %v585_v49, %v1585_v34  ;;  %v1224_v51 = vpop.f32.mrb[5].mxu0 }
 0x91a   :  { %v590_v52 = vrot.slane %v586_v50, 5 }
 0x91c   :  { %599 = vrot.lane.b32.xlu1 %v590_v52, %s1443_s25  ;;  %v592_v53 = vadd.f32 %v590_v52, %v1592_v41 }
 0x91e   :  { %v1122_v54 = vmul.f32 -1.442695, %v592_v53 }
 0x920   :  { %1347 = vpow2.f32 %v1122_v54 }
 0x92a   :  { %v1348_v55 = vpop.eup %1347 }
 0x92b   :  { %v596_v56 = vadd.f32 1.0, %v1348_v55 }
 0x92d   :  { %1349 = vrcp.f32 %v596_v56 }
 0x937   :  { %v1350_v57 = vpop.eup %1349 }
 0x938   :  { %v609_v63 = vsub.f32 1.0, %v1350_v57  ;;  %v617_v2 = vmul.f32 %v1350_v57, %v615_v0 }
 0x98e   :  { %v600_v58 = vpop.permute.xlu1 %599 }
 0x98f   :  { %v602_v59 = vmul.f32 %v1350_v57, %v600_v58 }
 0x991   :  { %604 = vrot.lane.b32.xlu0 %v602_v59, %s1443_s25 }
 0xa03   :  { %v605_v60 = vpop.permute.xlu0 %604 }
 0xa04   :  { %v607_v61 = vadd.f32 %v605_v60, %v1592_v41 }
 0xa06   :  { %1351 = vtanh.f32 %v607_v61 }
 0xa10   :  { %v1352_v62 = vpop.eup %1351 }
 0xa11   :  { %611 = vrot.lane.b32.xlu1 %v1352_v62, %s1444_s5 }
 0xa83   :  { %v612_v1 = vpop.permute.xlu1 %611 }
 0xa84   :  { %v614_v5 = vmul.f32 %v612_v1, %v609_v63 }
 0xa86   :  { %v1649_v7 = vadd.f32 %v617_v2, %v614_v5 }
 0xa88   :  { %v625_v8 = vrot.slane %v1649_v7, 3  ;;  %v726_v27 = vrot.slane %v1649_v7, 7 }
 0xa8a   :  { %626 = vrot.lane.b32.xlu0 %v625_v8, %s1444_s5 }
 0xafc   :  { %v627_v10 = vpop.permute.xlu0 %626 }
 0xafd   :  { %1234 = vmatmul.mubr.msk.f32.vlgmr.msra.gmra.mrb[4].mxu1 %vm182_vm1, %v627_v10 }
 0xafe   :  { %1310 = vmatpush3.bf16.msra.mxu1 %v1506_v4  ;;  %1255 = vmatprep.mubr.msk.f32.mxu1 %vm1441_vm0, %v1442_v6 }
 0xaff   :  { %1311 = vmatprep.subr.bf16.mxu1 %v1440_v3 }
 0xb02   :  { %1313 = vmatpush3.bf16.msra.mxu1 %v1523_v9 }
 0xbd0   :  { %v696_v11 = vpop.f32.mrb[4].mxu1 }
 0xbd1   :  { %v697_v12 = vadd.f32 %v696_v11, %v1585_v34  ;;  %v1235_v13 = vpop.f32.mrb[5].mxu1 }
 0xbd3   :  { %v701_v14 = vrot.slane %v697_v12, 4 }
 0xbd5   :  { %710 = vrot.lane.b32.xlu1 %v701_v14, %s1443_s25  ;;  %v703_v15 = vadd.f32 %v701_v14, %v1592_v41 }
 0xbd7   :  { %v1124_v16 = vmul.f32 -1.442695, %v703_v15 }
 0xbd9   :  { %1353 = vpow2.f32 %v1124_v16 }
 0xbe3   :  { %v1354_v17 = vpop.eup %1353 }
 0xbe4   :  { %v707_v18 = vadd.f32 1.0, %v1354_v17 }
 0xbe6   :  { %1355 = vrcp.f32 %v707_v18 }
 0xbf0   :  { %v1356_v19 = vpop.eup %1355 }
 0xbf1   :  { %v720_v26 = vsub.f32 1.0, %v1356_v19  ;;  %v728_v29 = vmul.f32 %v1356_v19, %v726_v27 }
 0xc47   :  { %v711_v20 = vpop.permute.xlu1 %710 }
 0xc48   :  { %v713_v21 = vmul.f32 %v1356_v19, %v711_v20 }
 0xc4a   :  { %715 = vrot.lane.b32.xlu0 %v713_v21, %s1443_s25 }
 0xcbc   :  { %v716_v23 = vpop.permute.xlu0 %715 }
 0xcbd   :  { %v718_v24 = vadd.f32 %v716_v23, %v1592_v41 }
 0xcbf   :  { %1357 = vtanh.f32 %v718_v24 }
 0xcc9   :  { %v1358_v25 = vpop.eup %1357 }
 0xcca   :  { %722 = vrot.lane.b32.xlu1 %v1358_v25, %s1444_s5 }
 0xd3c   :  { %v723_v28 = vpop.permute.xlu1 %722 }
 0xd3d   :  { %v725_v30 = vmul.f32 %v723_v28, %v720_v26 }
 0xd3f   :  { %v1666_v31 = vadd.f32 %v728_v29, %v725_v30 }
 0xd41   :  { %v736_v32 = vrot.slane %v1666_v31, 4  ;;  %v837_v48 = vrot.slane %v1666_v31, 7 }
 0xd43   :  { %737 = vrot.lane.b32.xlu0 %v736_v32, %s1444_s5 }
 0xdb5   :  { %v738_v33 = vpop.permute.xlu0 %737 }
 0xdb6   :  { %1245 = vmatmul.mubr.msk.f32.vlgmr.msra.gmra.mrb[6].mxu0 %vm182_vm1, %v738_v33 }
 0xdb7   :  { %1316 = vmatpush3.bf16.msra.mxu0 %v1506_v4  ;;  %1266 = vmatprep.mubr.msk.f32.mxu0 %vm1441_vm0, %v1442_v6  ;;  %vm956_vm0 = vcmask 260102  }
 0xdb8   :  { %1317 = vmatprep.subr.bf16.mxu0 %v1440_v3 }
 0xdbb   :  { %1319 = vmatpush3.bf16.msra.mxu0 %v1523_v9 }
 0xe89   :  { %v807_v35 = vpop.f32.mrb[6].mxu0 }
 0xe8a   :  { %v808_v36 = vadd.f32 %v807_v35, %v1585_v34  ;;  %v1246_v37 = vpop.f32.mrb[7].mxu0 }
 0xe8c   :  { %v812_v38 = vrot.slane %v808_v36, 3 }
 0xe8e   :  { %821 = vrot.lane.b32.xlu1 %v812_v38, %s1443_s25  ;;  %v814_v39 = vadd.f32 %v812_v38, %v1592_v41 }
 0xe90   :  { %v1126_v40 = vmul.f32 -1.442695, %v814_v39 }
 0xe92   :  { %1359 = vpow2.f32 %v1126_v40 }
 0xe9c   :  { %v1360_v42 = vpop.eup %1359 }
 0xe9d   :  { %v818_v4 = vadd.f32 1.0, %v1360_v42 }
 0xe9f   :  { %1361 = vrcp.f32 %v818_v4 }
 0xea9   :  { %v1362_v43 = vpop.eup %1361 }
 0xeaa   :  { %v831_v47 = vsub.f32 1.0, %v1362_v43  ;;  %v839_v50 = vmul.f32 %v1362_v43, %v837_v48 }
 0xf00   :  { %v822_v6 = vpop.permute.xlu1 %821 }
 0xf01   :  { %v824_v44 = vmul.f32 %v1362_v43, %v822_v6 }
 0xf03   :  { %826 = vrot.lane.b32.xlu0 %v824_v44, %s1443_s25 }
 0xf75   :  { %v827_v3 = vpop.permute.xlu0 %826 }
 0xf76   :  { %v829_v9 = vadd.f32 %v827_v3, %v1592_v41 }
 0xf78   :  { %1363 = vtanh.f32 %v829_v9 }
 0xf82   :  { %v1364_v45 = vpop.eup %1363 }
 0xf83   :  { %833 = vrot.lane.b32.xlu1 %v1364_v45, %s1444_s5 }
 0xff5   :  { %v834_v49 = vpop.permute.xlu1 %833 }
 0xff6   :  { %v836_v51 = vmul.f32 %v834_v49, %v831_v47 }
 0xff8   :  { %v840_v52 = vadd.f32 %v839_v50, %v836_v51 }
 0xffa   :  { %v847_v53 = vrot.slane %v840_v52, 5  ;;  %v948_v11 = vrot.slane %v840_v52, 7 }
 0xffc   :  { %848 = vrot.lane.b32.xlu0 %v847_v53, %s1444_s5 }
0x106e   :  { %v849_v54 = vpop.permute.xlu0 %848 }
0x106f   :  { %1256 = vmatmul.mubr.msk.f32.vlgmr.msra.gmra.mrb[6].mxu1 %vm182_vm1, %v849_v54 }
0x1142   :  { %v918_v55 = vpop.f32.mrb[6].mxu1 }
0x1143   :  { %v919_v56 = vadd.f32 %v918_v55, %v1585_v34  ;;  %v1257_v57 = vpop.f32.mrb[7].mxu1 }
0x1145   :  { %v923_v58 = vrot.slane %v919_v56, 2 }
0x1147   :  { %932 = vrot.lane.b32.xlu1 %v923_v58, %s1443_s25  ;;  %v925_v59 = vadd.f32 %v923_v58, %v1592_v41 }
0x1149   :  { %v1128_v60 = vmul.f32 -1.442695, %v925_v59 }
0x114b   :  { %1365 = vpow2.f32 %v1128_v60 }
0x1155   :  { %v1366_v61 = vpop.eup %1365 }
0x1156   :  { %v929_v62 = vadd.f32 1.0, %v1366_v61 }
0x1158   :  { %1367 = vrcp.f32 %v929_v62 }
0x1162   :  { %v1368_v63 = vpop.eup %1367 }
0x1163   :  { %v942_v10 = vsub.f32 1.0, %v1368_v63  ;;  %v950_v13 = vmul.f32 %v1368_v63, %v948_v11 }
0x11b9   :  { %v933_v0 = vpop.permute.xlu1 %932 }
0x11ba   :  { %v935_v1 = vmul.f32 %v1368_v63, %v933_v0 }
0x11bc   :  { %937 = vrot.lane.b32.xlu0 %v935_v1, %s1443_s25 }
0x122e   :  { %v938_v2 = vpop.permute.xlu0 %937 }
0x122f   :  { %v940_v5 = vadd.f32 %v938_v2, %v1592_v41 }
0x1231   :  { %1369 = vtanh.f32 %v940_v5 }
0x123b   :  { %v1370_v8 = vpop.eup %1369 }
0x123c   :  { %944 = vrot.lane.b32.xlu1 %v1370_v8, %s1444_s5 }
0x12ae   :  { %v945_v12 = vpop.permute.xlu1 %944 }
0x12af   :  { %v947_v14 = vmul.f32 %v945_v12, %v942_v10 }
0x12b1   :  { %v951_v15 = vadd.f32 %v950_v13, %v947_v14 }
0x12b3   :  { %v958_v16 = vrot.slane %v951_v15, 6 }
0x12b5   :  { %959 = vrot.lane.b32.xlu0 %v958_v16, %s1444_s5 }
0x1327   :  { %v960_v17 = vpop.permute.xlu0 %959 }
0x1328   :  { %1267 = vmatmul.mubr.msk.f32.vlgmr.msra.gmra.mrb[8].mxu0 %vm182_vm1, %v960_v17  ;;  %vm1067_vm1 = vcmask 261127  }
0x13fb   :  { %v1029_v18 = vpop.f32.mrb[8].mxu0 }
0x13fc   :  { %v1030_v19 = vadd.f32 %v1029_v18, %v1585_v34  ;;  %v1268_v20 = vpop.f32.mrb[9].mxu0 }
0x13fe   :  { %v1034_v21 = vrot.slane %v1030_v19, 1 }
0x1400   :  { %1043 = vrot.lane.b32.xlu1 %v1034_v21, %s1443_s25  ;;  %v1036_v23 = vadd.f32 %v1034_v21, %v1592_v41 }
0x1402   :  { %v1130_v24 = vmul.f32 -1.442695, %v1036_v23 }
0x1404   :  { %1371 = vpow2.f32 %v1130_v24 }
0x140e   :  { %v1372_v25 = vpop.eup %1371 }
0x140f   :  { %v1040_v26 = vadd.f32 1.0, %v1372_v25 }
0x1411   :  { %1373 = vrcp.f32 %v1040_v26 }
0x141b   :  { %v1374_v27 = vpop.eup %1373 }
0x1472   :  { %v1044_v28 = vpop.permute.xlu1 %1043 }
0x1473   :  { %v1046_v29 = vmul.f32 %v1374_v27, %v1044_v28 }
0x1475   :  { %1048 = vrot.lane.b32.xlu0 %v1046_v29, %s1443_s25 }
0x1479   :  { %398 = vrot.lane.b32.xlu0 %v1613_v22, %s1444_s5  ;;  %v1059_v22 = vrot.slane %v951_v15, 7 }
0x147b   :  { %v1061_v37 = vmul.f32 %v1374_v27, %v1059_v22 }
0x147d   :  { %620 = vrot.lane.b32.xlu0 %v1649_v7, %s1444_s5 }
0x1481   :  { %842 = vrot.lane.b32.xlu0 %v840_v52, %s1444_s5 }
0x14e7   :  { %v1049_v34 = vpop.permute.xlu0 %1048 }
0x14e8   :  { %v1051_v30 = vadd.f32 %v1049_v34, %v1592_v41  ;;  %v1053_v41 = vsub.f32 1.0, %v1374_v27 }
0x14ea   :  { %1375 = vtanh.f32 %v1051_v30 }
0x14eb   :  { %v399_v32 = vpop.permute.xlu0 %398 }
0x14ec   :  { %402 = vst.msk [vmem:[#allocation4] sm:$0x2] %vm401_vm11, %v399_v32 }
0x14ef   :  { %v621_v33 = vpop.permute.xlu0 %620 }
0x14f0   :  { %624 = vst.msk [vmem:[#allocation4] sm:$0x8] %vm623_vm12, %v621_v33 }
0x14f3   :  { %v843_v35 = vpop.permute.xlu0 %842 }
0x14f4   :  { %v1376_v36 = vpop.eup %1375  ;;  %846 = vst.msk [vmem:[#allocation4] sm:$0x20] %vm845_vm13, %v843_v35 }
0x14f5   :  { %1055 = vrot.lane.b32.xlu1 %v1376_v36, %s1444_s5 }
0x14f9   :  { %509 = vrot.lane.b32.xlu1 %v1631_v46, %s1444_s5 }
0x14fd   :  { %731 = vrot.lane.b32.xlu1 %v1666_v31, %s1444_s5 }
0x1501   :  { %953 = vrot.lane.b32.xlu1 %v951_v15, %s1444_s5 }
0x1567   :  { %v1056_v7 = vpop.permute.xlu1 %1055 }
0x1568   :  { %v1058_v38 = vmul.f32 %v1056_v7, %v1053_v41 }
0x156a   :  { %v1062_v39 = vadd.f32 %v1061_v37, %v1058_v38 }
0x156b   :  { %v510_v40 = vpop.permute.xlu1 %509 }
0x156c   :  { %513 = vst.msk [vmem:[#allocation4] sm:$0x4] %vm512_vm14, %v510_v40  ;;  %1064 = vrot.lane.b32.xlu0 %v1062_v39, %s1444_s5 }
0x156f   :  { %v732_v42 = vpop.permute.xlu1 %731 }
0x1570   :  { %735 = vst.msk [vmem:[#allocation4] sm:$0x10] %vm734_vm15, %v732_v42 }
0x1573   :  { %v954_v46 = vpop.permute.xlu1 %953 }
0x1574   :  { %957 = vst.msk [vmem:[#allocation4] sm:$0x40] %vm956_vm0, %v954_v46 }
0x15de   :  { %v1065_v31 = vpop.permute.xlu0 %1064 }
0x15df   :  { %1068 = vst.msk [vmem:[#allocation4] sm:$0x80] %vm1067_vm1, %v1065_v31  ;;  %1069 = vst.msk [vmem:[#allocation6 - $0x7] sm:$0x80] %vm1067_vm1, %v1065_v31 }
0x15e0   :  { %1400 = shalt.err (!%p1397_p9)
}
0x15e1   :  { %s1401_s14 = scalar_lea.hbm %s1749_s7, 128 }
0x15e2   :  { %p1402_p10 = scmp.ne.s32.totalorder %s1749_s7, %s1401_s14  ;;  %p1405_p11 = scmp.lt.u32.totalorder %s1401_s14, %s1749_s7 }
0x15e4   :  { %p1407_p12 = pnand %p1405_p11, %p1402_p10 }
0x15e6   :  { %1410 = shalt.err (!%p1407_p12)
}
0x15e7   :  { %1079 = dma.vmem_to_hbm [thread:$0]  %s1077_s10, 128, %s1749_s7, [#allocation5]  }
0x15e8   :  { %s1411_s21 = scalar_lea.vmem %s1710_s12, 16  ;;  %s1415_s4 = scalar_lea.vmem %s1710_s12, 32 }
0x15e9   :  { %p1412_p13 = scmp.ne.s32.totalorder %s1710_s12, %s1411_s21  ;;  %p1416_p0 = scmp.lt.s32.totalorder %s1710_s12, %s1710_s12 }
0x15ea   :  { %p1417_p1 = scmp.lt.s32.totalorder %s1415_s4, %s1411_s21 }
0x15ec   :  { %p1418_p2 = por %p1417_p1, %p1416_p0 }
0x15ee   :  { %p1419_p3 = pnand %p1418_p2, %p1412_p13 }
0x15f0   :  { %1422 = shalt.err (!%p1419_p3)
}
0x15f1   :  { %s1423_s27 = scalar_lea.hbm %s1750_s8, 16 }
0x15f2   :  { %p1424_p4 = scmp.ne.s32.totalorder %s1750_s8, %s1423_s27  ;;  %p1427_p5 = scmp.lt.u32.totalorder %s1423_s27, %s1750_s8 }
0x15f4   :  { %p1429_p6 = pnand %p1427_p5, %p1424_p4 }
0x15f6   :  { %1432 = shalt.err (!%p1429_p6)
}
0x15f7   :  { %1089 = dma.vmem_to_hbm [thread:$0]  %s1710_s12, 16, %s1750_s8, [#allocation7]  }
0x15f8   :  { %1435 = dma.done.wait [#allocation5], 128  }
0x15f9   :  { %1436 = vsyncadd [#allocation5], 4294967168 }
0x15fa   :  { %1437 = dma.done.wait [#allocation7], 16  }
0x15fb   :  { %1438 = vsyncadd [#allocation7], 4294967280 }
0x15fc   :  { %1096 = vsyncpa [#allocation5], 1 }
0x15fd   :  { %1097 = vsyncpa [#allocation7], 1 }

</bundles_post_ra>
